<compile_context>
chip_gen: v7x
topology: tpu7x:2x2x1
jax: 0.10.0
libtpu: 0.0.40
codegen_flags: <defaults>
</compile_context>

<pallas_src>
import functools

import jax
import jax.numpy as jnp
from jax.experimental import pallas as pl
from jax.experimental.pallas import tpu as pltpu

_VMEM_LIMIT_BYTES = 32 * 1024 * 1024  # safe on v5e/v6e (128 MiB phys) and v7x (64 MiB phys)


def _is_v7():
    try:
        return "v7" in jax.devices()[0].device_kind.lower()
    except Exception:  # pragma: no cover - defensive
        return False


def _focal_loss_kernel(pred_ref, targ_ref, out_ref, *, gamma, alpha, tile_m,
                       blocks_per_partial, n_valid, need_mask,
                       targets_are_labels, approx_reciprocal):
    p_idx = pl.program_id(0)   # per-TensorCore partial (size 1 on v5e/v6e)
    i = pl.program_id(1)       # reduction axis over row tiles

    # The output block index depends only on p_idx, so the (1, 8, C) block is
    # VMEM-resident across the whole reduction axis: init at i == 0 and
    # accumulate directly into it (no separate scratch, no epilogue copy).
    @pl.when(i == 0)
    def _():
        out_ref[...] = jnp.zeros_like(out_ref)

    x = pred_ref[...].astype(jnp.float32)   # logits (f32 or bf16 upcast)
    c = x.shape[-1]

    if targets_are_labels:
        lab = targ_ref[...]                                        # (tile_m, 1) int32
        cls = jax.lax.broadcasted_iota(jnp.int32, x.shape, 1)      # lane index
        z = (cls == lab).astype(jnp.float32)                       # in-kernel one-hot
    else:
        z = targ_ref[...].astype(jnp.float32)                      # dense float targets

    # Stable BCE-with-logits and sigmoid sharing a single exp(-|x|):
    #   bce = max(x, 0) - x*z + log1p(e),   e = exp(-|x|)
    #   p   = 1/(1+e)  if x >= 0  else  e/(1+e)
    e = jnp.exp(-jnp.abs(x))
    bce = jnp.maximum(x, 0.0) - x * z + jnp.log1p(e)
    if approx_reciprocal:
        inv_1pe = pl.reciprocal(1.0 + e, approx=True)   # single EUP vrcp (~1e-4 rel err)
    else:
        inv_1pe = 1.0 / (1.0 + e)
    prob = jnp.where(x >= 0.0, inv_1pe, e * inv_1pe)

    # m = 1 - p_t computed directly (fewer VALU ops than forming p_t first):
    #   1 - p_t = z + p*(1 - 2z)
    m = z + prob * (1.0 - 2.0 * z)

    # Modulating factor (1 - p_t)^gamma, strength-reduced for small int gamma
    # (gamma=2.0 -> m*m) to avoid exp(gamma*log(m)) on the EUP.
    if gamma:
        g_int = int(gamma)
        if float(g_int) == float(gamma) and 0 < g_int <= 4:
            mod = m
            for _ in range(g_int - 1):
                mod = mod * m
        else:
            mod = jnp.power(m, gamma)
        loss = mod * bce
    else:
        loss = bce

    if alpha is not None:
        # alpha weight folded into one affine: (1-alpha) + (2*alpha-1)*z
        loss = loss * ((1.0 - alpha) + (2.0 * alpha - 1.0) * z)

    # Pure-VPU partial accumulation into the vreg-shaped (8, C) output slab;
    # the cross-sublane/lane reduction + mean happen in the wrapper.
    # TODO(synk): if the (tile_m, C) loss slab materializes in VMEM on v5e,
    # restructure as a fori_loop over small row strips accumulating into (8, C).
    def _accum(l):
        out_ref[...] += l.reshape(tile_m // 8, 8, c).sum(axis=0)[None]

    if need_mask:
        row0 = (p_idx * blocks_per_partial + i) * tile_m
        is_edge = row0 + tile_m > n_valid

        @pl.when(is_edge)
        def _():
            # Select (not multiply) so garbage / NaN edge rows are dropped.
            rows = row0 + jax.lax.broadcasted_iota(jnp.int32, loss.shape, 0)
            _accum(jnp.where(rows < n_valid, loss, 0.0))

        @pl.when(jnp.logical_not(is_edge))
        def _():
            _accum(loss)
    else:
        _accum(loss)


def _focal_loss_call(pred2d, targ2d, *, gamma, alpha, targets_are_labels,
                     tile_m, num_partials, approx_reciprocal):
    n, c = pred2d.shape

    if num_partials is None:
        num_partials = 2 if _is_v7() else 1   # >1 is pure overhead on 1-TC chips
    num_partials = max(1, int(num_partials))

    # Row tile from a VMEM budget: inputs are double-buffered by the pipeline;
    # keep them under ~1/4 of the scoped limit, leaving room for the in-tile
    # elementwise temporaries.  Cap at 2048 rows (per-step DMA >> 0.35 us
    # fixed overhead at C >= 128).
    if tile_m is None:
        per_row = 2 * (c * pred2d.dtype.itemsize
                       + targ2d.shape[1] * targ2d.dtype.itemsize)
        tile_m = (_VMEM_LIMIT_BYTES // 4) // max(per_row, 1)
        tile_m = min(tile_m, 2048)
    n_rounded = max(8, ((n + 7) // 8) * 8)
    tile_m = max(8, (int(tile_m) // 8) * 8)
    tile_m = min(tile_m, n_rounded)

    blocks_total = pl.cdiv(n, tile_m)
    num_partials = min(num_partials, blocks_total)
    blocks_per_partial = pl.cdiv(blocks_total, num_partials)
    covered = num_partials * blocks_per_partial * tile_m
    # No jnp.pad: any over-coverage is handled by the in-kernel row mask.
    need_mask = covered != n
    last_block = blocks_total - 1

    kernel = functools.partial(
        _focal_loss_kernel, gamma=gamma, alpha=alpha, tile_m=tile_m,
        blocks_per_partial=blocks_per_partial, n_valid=n, need_mask=need_mask,
        targets_are_labels=targets_are_labels,
        approx_reciprocal=approx_reciprocal)

    # Clamp the block index so tiles past the end (uneven core split) read a
    # valid block; their logical rows are >= n so the mask zeroes them.
    def in_map(p, i):
        return (jnp.minimum(p * blocks_per_partial + i, last_block), 0)

    if num_partials > 1 and _is_v7():
        # Only core_parallel changes codegen; plain "parallel" would leave the
        # whole grid on one TC of a v7x.
        dim_sems = (pltpu.CORE_PARALLEL, pltpu.ARBITRARY)
    else:
        dim_sems = ("parallel", "arbitrary")

    targ_block = (tile_m, 1) if targets_are_labels else (tile_m, c)

    partials = pl.pallas_call(
        kernel,
        out_shape=jax.ShapeDtypeStruct((num_partials, 8, c), jnp.float32),
        grid_spec=pltpu.PrefetchScalarGridSpec(
            num_scalar_prefetch=0,
            grid=(num_partials, blocks_per_partial),
            in_specs=[
                pl.BlockSpec((tile_m, c), in_map),
                pl.BlockSpec(targ_block, in_map),
            ],
            out_specs=pl.BlockSpec((1, 8, c), lambda p, i: (p, 0, 0)),
        ),
        compiler_params=pltpu.CompilerParams(
            dimension_semantics=dim_sems,
            vmem_limit_bytes=_VMEM_LIMIT_BYTES),
    )(pred2d, targ2d)

    # Cross-sublane/lane reduction of the tiny partial slabs + mean in JAX.
    return jnp.sum(partials) / jnp.float32(n * c)


def focal_loss(prediction, target, *, gamma=2.0, alpha=0.25,
               tile_m=None, num_partials=None, approx_reciprocal=False):
    """Module-equivalent path: scalar mean focal loss over dense float targets
    (matches FocalLoss.forward / torch.mean of the per-entry loss)."""
    assert prediction.shape == target.shape and prediction.ndim == 3
    b, a, c = prediction.shape
    return _focal_loss_call(
        prediction.reshape(b * a, c), target.reshape(b * a, c),
        gamma=gamma, alpha=alpha, targets_are_labels=False,
        tile_m=tile_m, num_partials=num_partials,
        approx_reciprocal=approx_reciprocal)


def focal_loss_from_labels(prediction, labels, *, gamma=2.0, alpha=0.25,
                           tile_m=None, num_partials=None,
                           approx_reciprocal=False):
    """Fast path: int class labels, one-hot target synthesized in-kernel
    (same result as focal_loss(prediction, one_hot(labels)), ~half the HBM)."""
    assert prediction.ndim == 3
    b, a, c = prediction.shape
    assert labels.shape == (b, a)
    return _focal_loss_call(
        prediction.reshape(b * a, c),
        labels.reshape(b * a, 1).astype(jnp.int32),
        gamma=gamma, alpha=alpha, targets_are_labels=True,
        tile_m=tile_m, num_partials=num_partials,
        approx_reciprocal=approx_reciprocal)


def _focal_loss_ref(prediction, target, gamma=2.0, alpha=0.25):
    x = prediction.astype(jnp.float32)
    z = target.astype(jnp.float32)
    bce = jnp.maximum(x, 0.0) - x * z + jnp.log1p(jnp.exp(-jnp.abs(x)))
    p = jax.nn.sigmoid(x)
    p_t = z * p + (1.0 - z) * (1.0 - p)
    mod = jnp.power(1.0 - p_t, gamma)
    aw = z * alpha + (1.0 - z) * (1.0 - alpha)
    return jnp.mean(mod * aw * bce)


if __name__ == "__main__":
    key = jax.random.PRNGKey(0)
    k_pred, k_lab, k_pred2 = jax.random.split(key, 3)

    # Case 1: [batch, num_anchors, num_classes] = [2, 64, 128], dense one-hot
    # targets (the module interface), single row tile.
    batch, anchors, classes = 2, 64, 128
    pred = jax.random.normal(k_pred, (batch, anchors, classes), jnp.float32) * 2.0
    labels = jax.random.randint(k_lab, (batch, anchors), 0, classes)
    target = jax.nn.one_hot(labels, classes, dtype=jnp.float32)

    out1 = jax.block_until_ready(focal_loss(pred, target, gamma=2.0, alpha=0.25))
    ref1 = _focal_loss_ref(pred, target, gamma=2.0, alpha=0.25)
    assert jnp.allclose(out1, ref1, rtol=1e-5, atol=1e-6), (out1, ref1)

    # Case 2: ragged row count + several row tiles (exercises the no-pad edge
    # mask and multi-step accumulation).
    b2, a2 = 2, 37   # n = 74 rows, not a multiple of the 32-row tile
    pred2 = jax.random.normal(k_pred2, (b2, a2, classes), jnp.float32) * 2.0
    labels2 = jax.random.randint(k_lab, (b2, a2), 0, classes)
    target2 = jax.nn.one_hot(labels2, classes, dtype=jnp.float32)

    out2 = jax.block_until_ready(focal_loss(pred2, target2, tile_m=32))
    ref2 = _focal_loss_ref(pred2, target2)
    assert jnp.allclose(out2, ref2, rtol=1e-5, atol=1e-6), (out2, ref2)

    # Case 3: bf16 logits + int labels fast path (one-hot built in-kernel).
    out3 = jax.block_until_ready(
        focal_loss_from_labels(pred2.astype(jnp.bfloat16), labels2, tile_m=32))
    ref3 = _focal_loss_ref(pred2.astype(jnp.bfloat16).astype(jnp.float32), target2)
    assert jnp.allclose(out3, ref3, rtol=1e-5, atol=1e-6), (out3, ref3)

    print("KERNEL_OK")
</pallas_src>

<mosaic_0001>
module attributes {stable_mosaic.version = 11 : i64} {
  func.func @_focal_loss_kernel(%arg0: i32, %arg1: i32, %arg2: memref<128x128xf32, #tpu.memory_space<vmem>>, %arg3: memref<128x128xf32, #tpu.memory_space<vmem>>, %arg4: memref<1x8x128xf32, #tpu.memory_space<vmem>>) attributes {dimension_semantics = [#tpu.dimension_semantics<parallel>, #tpu.dimension_semantics<arbitrary>], iteration_bounds = array<i64: 1, 1>, scalar_prefetch = 0 : i64, scratch_operands = 0 : i64, tpu.core_type = #tpu.core_type<tc>, window_params = [{transform_indices = @transform_0, window_bounds = array<i64: 128, 128>}, {transform_indices = @transform_1, window_bounds = array<i64: 128, 128>}, {transform_indices = @transform_2, window_bounds = array<i64: 1, 8, 128>}]} {
    %c0_i32 = arith.constant 0 : i32
    %0 = arith.cmpi eq, %arg1, %c0_i32 : i32
    %1 = arith.extui %0 : i1 to i32
    %c0_i32_0 = arith.constant 0 : i32
    %2 = arith.cmpi ne, %1, %c0_i32_0 : i32
    scf.if %2 {
      %cst_19 = arith.constant 0.000000e+00 : f32
      %42 = vector.broadcast %cst_19 : f32 to vector<1x8x128xf32>
      %c0_20 = arith.constant 0 : index
      %c0_21 = arith.constant 0 : index
      %c0_22 = arith.constant 0 : index
      %43 = vector.load %arg4[%c0_20, %c0_21, %c0_22] : memref<1x8x128xf32, #tpu.memory_space<vmem>>, vector<1x8x128xf32>
      tpu.vector_store %arg4[%c0_20, %c0_21, %c0_22], %42 {strides = array<i32>} : memref<1x8x128xf32, #tpu.memory_space<vmem>>, vector<1x8x128xf32>,
    } else {
    }
    %c0 = arith.constant 0 : index
    %c0_1 = arith.constant 0 : index
    %3 = vector.load %arg2[%c0, %c0_1] : memref<128x128xf32, #tpu.memory_space<vmem>>, vector<128x128xf32>
    %c0_2 = arith.constant 0 : index
    %c0_3 = arith.constant 0 : index
    %4 = vector.load %arg3[%c0_2, %c0_3] : memref<128x128xf32, #tpu.memory_space<vmem>>, vector<128x128xf32>
    %5 = math.absf %3 : vector<128x128xf32>
    %cst = arith.constant 0.000000e+00 : f32
    %6 = vector.broadcast %cst : f32 to vector<128x128xf32>
    %7 = arith.subf %6, %5 : vector<128x128xf32>
    %8 = math.exp %7 : vector<128x128xf32>
    %cst_4 = arith.constant 0.000000e+00 : f32
    %9 = vector.broadcast %cst_4 : f32 to vector<128x128xf32>
    %10 = arith.maximumf %3, %9 : vector<128x128xf32>
    %11 = arith.mulf %3, %4 : vector<128x128xf32>
    %12 = arith.subf %10, %11 : vector<128x128xf32>
    %13 = math.log1p %8 : vector<128x128xf32>
    %14 = arith.addf %12, %13 : vector<128x128xf32>
    %cst_5 = arith.constant 1.000000e+00 : f32
    %15 = vector.broadcast %cst_5 : f32 to vector<128x128xf32>
    %16 = arith.addf %15, %8 : vector<128x128xf32>
    %cst_6 = arith.constant 1.000000e+00 : f32
    %17 = vector.broadcast %cst_6 : f32 to vector<128x128xf32>
    %18 = arith.divf %17, %16 : vector<128x128xf32>
    %cst_7 = arith.constant 0.000000e+00 : f32
    %19 = vector.broadcast %cst_7 : f32 to vector<128x128xf32>
    %20 = arith.cmpf oge, %3, %19 : vector<128x128xf32>
    %21 = arith.mulf %8, %18 : vector<128x128xf32>
    %22 = arith.select %20, %18, %21 : vector<128x128xi1>, vector<128x128xf32>
    %cst_8 = arith.constant 2.000000e+00 : f32
    %23 = vector.broadcast %cst_8 : f32 to vector<128x128xf32>
    %24 = arith.mulf %23, %4 : vector<128x128xf32>
    %cst_9 = arith.constant 1.000000e+00 : f32
    %25 = vector.broadcast %cst_9 : f32 to vector<128x128xf32>
    %26 = arith.subf %25, %24 : vector<128x128xf32>
    %27 = arith.mulf %22, %26 : vector<128x128xf32>
    %28 = arith.addf %4, %27 : vector<128x128xf32>
    %29 = arith.mulf %28, %28 : vector<128x128xf32>
    %30 = arith.mulf %29, %14 : vector<128x128xf32>
    %cst_10 = arith.constant -5.000000e-01 : f32
    %31 = vector.broadcast %cst_10 : f32 to vector<128x128xf32>
    %32 = arith.mulf %31, %4 : vector<128x128xf32>
    %cst_11 = arith.constant 7.500000e-01 : f32
    %33 = vector.broadcast %cst_11 : f32 to vector<128x128xf32>
    %34 = arith.addf %33, %32 : vector<128x128xf32>
    %35 = arith.mulf %30, %34 : vector<128x128xf32>
    %c0_12 = arith.constant 0 : index
    %c0_13 = arith.constant 0 : index
    %c0_14 = arith.constant 0 : index
    %36 = vector.load %arg4[%c0_12, %c0_13, %c0_14] : memref<1x8x128xf32, #tpu.memory_space<vmem>>, vector<1x8x128xf32>
    %37 = vector.shape_cast %35 : vector<128x128xf32> to vector<16x8x128xf32>
    %cst_15 = arith.constant dense<0.000000e+00> : vector<8x128xf32>
    %38 = vector.multi_reduction <add>, %37, %cst_15 [0] : vector<16x8x128xf32> to vector<8x128xf32>
    %39 = vector.shape_cast %38 : vector<8x128xf32> to vector<1x8x128xf32>
    %40 = arith.addf %36, %39 : vector<1x8x128xf32>
    %c0_16 = arith.constant 0 : index
    %c0_17 = arith.constant 0 : index
    %c0_18 = arith.constant 0 : index
    %41 = vector.load %arg4[%c0_16, %c0_17, %c0_18] : memref<1x8x128xf32, #tpu.memory_space<vmem>>, vector<1x8x128xf32>
    tpu.vector_store %arg4[%c0_16, %c0_17, %c0_18], %40 {strides = array<i32>} : memref<1x8x128xf32, #tpu.memory_space<vmem>>, vector<1x8x128xf32>,
    return
  }
  func.func @transform_0(%arg0: i32, %arg1: i32) -> (i32, i32) {
    %c1_i32 = arith.constant 1 : i32
    %0 = arith.muli %arg0, %c1_i32 : i32
    %1 = arith.addi %0, %arg1 : i32
    %c0_i32 = arith.constant 0 : i32
    %2 = arith.minsi %1, %c0_i32 : i32
    %c0_i32_0 = arith.constant 0 : i32
    %c0_i32_1 = arith.constant 0 : i32
    return %2, %c0_i32_0 : i32, i32
  }
  func.func @transform_1(%arg0: i32, %arg1: i32) -> (i32, i32) {
    %c1_i32 = arith.constant 1 : i32
    %0 = arith.muli %arg0, %c1_i32 : i32
    %1 = arith.addi %0, %arg1 : i32
    %c0_i32 = arith.constant 0 : i32
    %2 = arith.minsi %1, %c0_i32 : i32
    %c0_i32_0 = arith.constant 0 : i32
    %c0_i32_1 = arith.constant 0 : i32
    return %2, %c0_i32_0 : i32, i32
  }
  func.func @transform_2(%arg0: i32, %arg1: i32) -> (i32, i32, i32) {
    %c0_i32 = arith.constant 0 : i32
    %c0_i32_0 = arith.constant 0 : i32
    %c0_i32_1 = arith.constant 0 : i32
    return %arg0, %c0_i32, %c0_i32_0 : i32, i32, i32
  }
}

</mosaic_0001>

<bundles_post_ra>
// kernel: tpu_custom_call.1
= control target key start
LH: loop header
LB: loop body
LE: loop exit
PB: predicated region body
PF: predicated region fallthrough
CT: control target
= control target key end

     0   :  { %7 = vsyncpa [#allocation3], 0  ;;  %s1634_s0 = inlined_call_operand.hbm [shape: f32[128,128], index: 0, kind: input, shape index: {}]   ;;  %s1635_s1 = inlined_call_operand.hbm [shape: f32[128,128], index: 1, kind: input, shape index: {}]   ;;  %s1636_s2 = inlined_call_operand.hbm [shape: f32[1,8,128], index: 2, kind: output, shape index: {}]  }
   0x1   :  { %8 = vsyncpa [#allocation6], 0 }
   0x2   :  { %9 = vsyncpa [#allocation4], 0  ;;  %s821_s9 = smov [#allocation2]   ;;  %s749_s13 = scalar_lea.hbm %s1634_s0, 2048 }
   0x3   :  { %s21_s10 = sshll.u32 %s821_s9, 4  ;;  %p750_p0 = scmp.ne.s32.totalorder %s1634_s0, %s749_s13  ;;  %s22_s10 = int_to_ptr.vmem [resolvable:$true] %s21_s10 }
   0x4   :  { %p753_p1 = scmp.lt.u32.totalorder %s749_s13, %s1634_s0 }
   0x6   :  { %p755_p2 = pnand %p753_p1, %p750_p0 }
   0x8   :  { %758 = shalt.err (!%p755_p2)
}
   0x9   :  { %s759_s18 = scalar_lea.vmem %s22_s10, 2048  ;;  %p764_p4 = scmp.lt.s32.totalorder %s22_s10, %s22_s10 }
   0xa   :  { %p760_p3 = scmp.ne.s32.totalorder %s22_s10, %s759_s18  ;;  %p765_p5 = scmp.lt.s32.totalorder %s759_s18, %s759_s18 }
   0xc   :  { %p766_p6 = por %p765_p5, %p764_p4 }
   0xe   :  { %p767_p7 = pnand %p766_p6, %p760_p3 }
  0x10   :  { %770 = shalt.err (!%p767_p7)
}
  0x11   :  { %s822_s19 = smov 128   ;;  %s823_s20 = smov 8  }
  0x12   :  { %27 = dma.hbm_to_vmem [thread:$0]  %s1634_s0, 2048, %s22_s10, [#allocation3], %s822_s19, %s822_s19, %s823_s20  }
  0x13   :  { %s824_s23 = smov [#allocation5]   ;;  %s771_s27 = scalar_lea.hbm %s1635_s1, 2048 }
  0x14   :  { %s39_s24 = sshll.u32 %s824_s23, 4  ;;  %p772_p8 = scmp.ne.s32.totalorder %s1635_s1, %s771_s27  ;;  %s40_s24 = int_to_ptr.vmem [resolvable:$true] %s39_s24 }
  0x15   :  { %p775_p9 = scmp.lt.u32.totalorder %s771_s27, %s1635_s1 }
  0x17   :  { %p777_p10 = pnand %p775_p9, %p772_p8 }
  0x19   :  { %780 = shalt.err (!%p777_p10)
}
  0x1a   :  { %s781_s4 = scalar_lea.vmem %s40_s24, 2048  ;;  %p786_p12 = scmp.lt.s32.totalorder %s40_s24, %s40_s24 }
  0x1b   :  { %p782_p11 = scmp.ne.s32.totalorder %s40_s24, %s781_s4  ;;  %p787_p13 = scmp.lt.s32.totalorder %s781_s4, %s781_s4 }
  0x1d   :  { %p788_p0 = por %p787_p13, %p786_p12 }
  0x1f   :  { %p789_p1 = pnand %p788_p0, %p782_p11 }
  0x21   :  { %792 = shalt.err (!%p789_p1)
}
  0x22   :  { %45 = dma.hbm_to_vmem [thread:$0]  %s1635_s1, 2048, %s40_s24, [#allocation6], %s822_s19, %s822_s19, %s823_s20  }
  0x23   :  { %815 = dma.done.wait [#allocation3], 2048  }
  0x24   :  { %816 = vsyncadd [#allocation3], 4294965248 }
  0x25   :  { %817 = dma.done.wait [#allocation6], 2048  }
  0x26   :  { %818 = vsyncadd [#allocation6], 4294965248  ;;  %v865_v0 = vld [vmem:[#allocation2] sm:$0xff]  ;;  %v867_v1 = vld [vmem:[#allocation2 + $0x8] sm:$0xff]  ;;  %s825_s1 = smov [#allocation7]  }
  0x27   :  { %1720 = vst [vmem:[#allocation11_spill] sm:$0xff] %v865_v0  ;;  %1721 = vst [vmem:[#allocation12_spill] sm:$0xff] %v867_v1  ;;  %v869_v2 = vld [vmem:[#allocation2 + $0x10] sm:$0xff]  ;;  %v871_v3 = vld [vmem:[#allocation2 + $0x18] sm:$0xff]  ;;  %v97_v7 = vand.u32 2147483647, %v865_v0 }
  0x28   :  { %1722 = vst [vmem:[#allocation13_spill] sm:$0xff] %v869_v2  ;;  %1723 = vst [vmem:[#allocation14_spill] sm:$0xff] %v871_v3  ;;  %v873_v4 = vld [vmem:[#allocation2 + $0x20] sm:$0xff]  ;;  %v875_v5 = vld [vmem:[#allocation2 + $0x28] sm:$0xff]  ;;  %v98_v8 = vand.u32 2147483647, %v867_v1 }
  0x29   :  { %1724 = vst [vmem:[#allocation15_spill] sm:$0xff] %v873_v4  ;;  %1725 = vst [vmem:[#allocation16_spill] sm:$0xff] %v875_v5  ;;  %v877_v6 = vld [vmem:[#allocation2 + $0x30] sm:$0xff]  ;;  %v99_v9 = vand.u32 2147483647, %v869_v2  ;;  %v884_v12 = vld [vmem:[#allocation2 + $0x38] sm:$0xff] }
  0x2a   :  { %1726 = vst [vmem:[#allocation17_spill] sm:$0xff] %v877_v6  ;;  %v100_v10 = vand.u32 2147483647, %v871_v3  ;;  %v101_v11 = vand.u32 2147483647, %v873_v4  ;;  %1727 = vst [vmem:[#allocation18_spill] sm:$0xff] %v884_v12 }
  0x2b   :  { %v886_v13 = vld [vmem:[#allocation2 + $0x40] sm:$0xff]  ;;  %v102_v14 = vand.u32 2147483647, %v875_v5  ;;  %v891_v17 = vld [vmem:[#allocation2 + $0x48] sm:$0xff]  ;;  %v893_v18 = vld [vmem:[#allocation2 + $0x50] sm:$0xff]  ;;  %v113_v21 = vsub.f32 0.0, %v97_v7 }
  0x2c   :  { %1728 = vst [vmem:[#allocation19_spill] sm:$0xff] %v886_v13  ;;  %1729 = vst [vmem:[#allocation20_spill] sm:$0xff] %v891_v17  ;;  %v895_v19 = vld [vmem:[#allocation2 + $0x58] sm:$0xff]  ;;  %v103_v20 = vand.u32 2147483647, %v877_v6  ;;  %v898_v22 = vld [vmem:[#allocation2 + $0x60] sm:$0xff] }
  0x2d   :  { %1730 = vst [vmem:[#allocation21_spill] sm:$0xff] %v893_v18  ;;  %1731 = vst [vmem:[#allocation22_spill] sm:$0xff] %v895_v19  ;;  %v900_v23 = vld [vmem:[#allocation2 + $0x68] sm:$0xff]  ;;  %v902_v24 = vld [vmem:[#allocation5] sm:$0xff]  ;;  %v114_v27 = vsub.f32 0.0, %v98_v8  ;;  %v115_v28 = vsub.f32 0.0, %v99_v9 }
  0x2e   :  { %1732 = vst [vmem:[#allocation23_spill] sm:$0xff] %v898_v22  ;;  %1733 = vst [vmem:[#allocation24_spill] sm:$0xff] %v900_v23  ;;  %v904_v25 = vld [vmem:[#allocation5 + $0x8] sm:$0xff]  ;;  %v906_v26 = vld [vmem:[#allocation5 + $0x10] sm:$0xff]  ;;  %v116_v29 = vsub.f32 0.0, %v100_v10  ;;  %v117_v34 = vsub.f32 0.0, %v101_v11  ;;  %v918_v35 = vmul.f32 %v902_v24, %v865_v0 }
  0x2f   :  { %1734 = vst [vmem:[#allocation25_spill] sm:$0xff] %v902_v24  ;;  %1735 = vst [vmem:[#allocation26_spill] sm:$0xff] %v904_v25  ;;  %v908_v30 = vld [vmem:[#allocation2 + $0x70] sm:$0xff]  ;;  %v910_v31 = vld [vmem:[#allocation2 + $0x78] sm:$0xff]  ;;  %v922_v36 = vmul.f32 %v904_v25, %v867_v1  ;;  %v926_v37 = vmul.f32 %v906_v26, %v869_v2  ;;  %v104_v41 = vand.u32 2147483647, %v884_v12 }
  0x30   :  { %1736 = vst [vmem:[#allocation27_spill] sm:$0xff] %v906_v26  ;;  %1737 = vst [vmem:[#allocation28_spill] sm:$0xff] %v908_v30  ;;  %v912_v32 = vld [vmem:[#allocation5 + $0x18] sm:$0xff]  ;;  %v914_v33 = vld [vmem:[#allocation5 + $0x20] sm:$0xff]  ;;  %v118_v42 = vsub.f32 0.0, %v102_v14  ;;  %v119_v49 = vsub.f32 0.0, %v103_v20 }
  0x31   :  { %1738 = vst [vmem:[#allocation29_spill] sm:$0xff] %v910_v31  ;;  %1739 = vst [vmem:[#allocation30_spill] sm:$0xff] %v912_v32  ;;  %v928_v38 = vld [vmem:[#allocation5 + $0x28] sm:$0xff]  ;;  %v930_v39 = vld [vmem:[#allocation5 + $0x30] sm:$0xff]  ;;  %v937_v43 = vmul.f32 %v912_v32, %v871_v3  ;;  %v941_v44 = vmul.f32 %v914_v33, %v873_v4  ;;  %v105_v47 = vand.u32 2147483647, %v886_v13 }
  0x32   :  { %1740 = vst [vmem:[#allocation31_spill] sm:$0xff] %v914_v33  ;;  %1741 = vst [vmem:[#allocation32_spill] sm:$0xff] %v928_v38  ;;  %v932_v40 = vld [vmem:[#allocation5 + $0x38] sm:$0xff]  ;;  %v943_v45 = vld [vmem:[#allocation5 + $0x40] sm:$0xff]  ;;  %v106_v48 = vand.u32 2147483647, %v891_v17  ;;  %v951_v50 = vmul.f32 %v928_v38, %v875_v5  ;;  %v957_v54 = vmul.f32 %v930_v39, %v877_v6 }
  0x33   :  { %1742 = vst [vmem:[#allocation33_spill] sm:$0xff] %v930_v39  ;;  %1743 = vst [vmem:[#allocation34_spill] sm:$0xff] %v932_v40  ;;  %v945_v46 = vld [vmem:[#allocation5 + $0x48] sm:$0xff]  ;;  %v107_v51 = vand.u32 2147483647, %v893_v18  ;;  %v963_v58 = vmul.f32 %v932_v40, %v884_v12  ;;  %v969_v61 = vmul.f32 %v943_v45, %v886_v13  ;;  %v120_v63 = vsub.f32 0.0, %v104_v41 }
  0x34   :  { %1744 = vst [vmem:[#allocation35_spill] sm:$0xff] %v943_v45  ;;  %1745 = vst [vmem:[#allocation36_spill] sm:$0xff] %v945_v46  ;;  %v108_v52 = vand.u32 2147483647, %v895_v19  ;;  %v129_v53 = vmul.f32 1.442695, %v113_v21  ;;  %v973_v62 = vmul.f32 %v945_v46, %v891_v17 }
  0x35   :  { %v109_v55 = vand.u32 2147483647, %v898_v22  ;;  %v110_v56 = vand.u32 2147483647, %v900_v23  ;;  %v131_v57 = vmul.f32 1.442695, %v114_v27 }
  0x36   :  { %v111_v59 = vand.u32 2147483647, %v908_v30  ;;  %v112_v60 = vand.u32 2147483647, %v910_v31  ;;  %v121_v7 = vsub.f32 0.0, %v105_v47  ;;  %v122_v8 = vsub.f32 0.0, %v106_v48 }
  0x37   :  { %v133_v9 = vmul.f32 1.442695, %v115_v28  ;;  %v123_v10 = vsub.f32 0.0, %v107_v51  ;;  %v124_v11 = vsub.f32 0.0, %v108_v52  ;;  %653 = vpow2.f32 %v129_v53  ;;  %v975_v20 = vld [vmem:[#allocation5 + $0x50] sm:$0xff]  ;;  %v977_v15 = vld [vmem:[#allocation5 + $0x58] sm:$0xff] }
  0x38   :  { %v135_v14 = vmul.f32 1.442695, %v116_v29  ;;  %1746 = vst [vmem:[#allocation37_spill] sm:$0xff] %v975_v20  ;;  %v125_v21 = vsub.f32 0.0, %v109_v55  ;;  %v126_v27 = vsub.f32 0.0, %v110_v56  ;;  %655 = vpow2.f32 %v131_v57  ;;  %1747 = vst [vmem:[#allocation38_spill] sm:$0xff] %v977_v15 }
  0x39   :  { %v137_v16 = vmul.f32 1.442695, %v117_v34  ;;  %v127_v45 = vsub.f32 0.0, %v111_v59  ;;  %v128_v40 = vsub.f32 0.0, %v112_v60  ;;  %v139_v46 = vmul.f32 1.442695, %v118_v42 }
  0x3a   :  { %v981_v41 = vmul.f32 %v975_v20, %v893_v18  ;;  %657 = vpow2.f32 %v133_v9  ;;  %v141_v28 = vmul.f32 1.442695, %v119_v49  ;;  %v143_v47 = vmul.f32 1.442695, %v120_v63  ;;  %v999_v9 = vld [vmem:[#allocation5 + $0x60] sm:$0xff]  ;;  %s633_s6 = sshll.u32 %s825_s1, 4  ;;  %s634_s6 = int_to_ptr.vmem [resolvable:$true] %s633_s6 }
  0x3b   :  { %v985_v29 = vmul.f32 %v977_v15, %v895_v19  ;;  %659 = vpow2.f32 %v135_v14  ;;  %v145_v48 = vmul.f32 1.442695, %v121_v7  ;;  %v147_v51 = vmul.f32 1.442695, %v122_v8  ;;  %1749 = vst [vmem:[#allocation40_spill] sm:$0xff] %v999_v9  ;;  %s793_s7 = scalar_lea.vmem %s634_s6, 128  ;;  %p798_p3 = scmp.lt.s32.totalorder %s634_s6, %s634_s6 }
  0x3c   :  { %v149_v34 = vmul.f32 1.442695, %v123_v10  ;;  %661 = vpow2.f32 %v137_v16  ;;  %v151_v52 = vmul.f32 1.442695, %v124_v11  ;;  %v153_v53 = vmul.f32 1.442695, %v125_v21  ;;  %p794_p2 = scmp.ne.s32.totalorder %s634_s6, %s793_s7  ;;  %p799_p4 = scmp.lt.s32.totalorder %s793_s7, %s793_s7 }
  0x3d   :  { %v155_v55 = vmul.f32 1.442695, %v126_v27  ;;  %663 = vpow2.f32 %v139_v46  ;;  %v157_v42 = vmul.f32 1.442695, %v127_v45  ;;  %v159_v56 = vmul.f32 1.442695, %v128_v40 }
  0x3e   :  { %v163_v57 = vmax.f32 %v869_v2, 0.0  ;;  %665 = vpow2.f32 %v141_v28  ;;  %v164_v49 = vmax.f32 %v871_v3, 0.0  ;;  %v165_v59 = vmax.f32 %v873_v4, 0.0  ;;  %v1001_v10 = vld [vmem:[#allocation5 + $0x68] sm:$0xff]  ;;  %v1008_v28 = vld [vmem:[#allocation5 + $0x70] sm:$0xff]  ;;  %p800_p5 = por %p799_p4, %p798_p3 }
  0x3f   :  { %v166_v60 = vmax.f32 %v875_v5, 0.0  ;;  %667 = vpow2.f32 %v143_v47  ;;  %v167_v63 = vmax.f32 %v877_v6, 0.0  ;;  %v168_v16 = vmax.f32 %v884_v12, 0.0  ;;  %1750 = vst [vmem:[#allocation41_spill] sm:$0xff] %v1001_v10  ;;  %1752 = vst [vmem:[#allocation43_spill] sm:$0xff] %v1008_v28  ;;  %v1010_v47 = vld [vmem:[#allocation5 + $0x78] sm:$0xff] }
  0x40   :  { %v169_v7 = vmax.f32 %v886_v13, 0.0  ;;  %669 = vpow2.f32 %v145_v48  ;;  %v170_v45 = vmax.f32 %v891_v17, 0.0  ;;  %v171_v40 = vmax.f32 %v893_v18, 0.0  ;;  %1753 = vst [vmem:[#allocation44_spill] sm:$0xff] %v1010_v47  ;;  %p801_p6 = pnand %p800_p5, %p794_p2 }
  0x41   :  { %v172_v46 = vmax.f32 %v895_v19, 0.0  ;;  %v997_v8 = vpop.eup %653  ;;  %671 = vpow2.f32 %v147_v51  ;;  %v173_v11 = vmax.f32 %v898_v22, 0.0  ;;  %v174_v14 = vmax.f32 %v900_v23, 0.0 }
  0x42   :  { %1748 = vst [vmem:[#allocation39_spill] sm:$0xff] %v997_v8  ;;  %v175_v21 = vmax.f32 %v908_v30, 0.0  ;;  %v1006_v27 = vpop.eup %655  ;;  %673 = vpow2.f32 %v149_v34  ;;  %v176_v48 = vmax.f32 %v910_v31, 0.0  ;;  %v189_v15 = vmul.f32 %v999_v9, %v898_v22 }
  0x43   :  { %1751 = vst [vmem:[#allocation42_spill] sm:$0xff] %v1006_v27  ;;  %v190_v51 = vmul.f32 %v1001_v10, %v900_v23  ;;  %675 = vpow2.f32 %v151_v52  ;;  %v191_v20 = vmul.f32 %v1008_v28, %v908_v30  ;;  %v192_v19 = vmul.f32 %v1010_v47, %v910_v31 }
  0x44   :  { %v1754_v39 = vmax.f32 %v865_v0, 0.0  ;;  %v1026_v34 = vpop.eup %657  ;;  %677 = vpow2.f32 %v153_v53  ;;  %v1756_v9 = vmax.f32 %v867_v1, 0.0  ;;  %v1034_v52 = vsub.f32 %v163_v57, %v926_v37  ;;  %v1849_v1 = vld [vmem:[#allocation15_spill] sm:$0xff] }
  0x45   :  { %1755 = vst [vmem:[#allocation45_spill] sm:$0xff] %v1026_v34  ;;  %v1037_v30 = vadd.f32 1.0, %v997_v8  ;;  %v1039_v31 = vpop.eup %659  ;;  %679 = vpow2.f32 %v155_v55  ;;  %v1048_v53 = vadd.f32 1.0, %v1006_v27  ;;  %v1053_v37 = vsub.f32 %v166_v60, %v951_v50 }
  0x46   :  { %v1024_v38 = vsub.f32 %v1754_v39, %v918_v35  ;;  %v1031_v22 = vsub.f32 %v1756_v9, %v922_v36  ;;  %1757 = vst [vmem:[#allocation46_spill] sm:$0xff] %v1039_v31  ;;  %v1042_v35 = vsub.f32 %v164_v49, %v937_v43  ;;  %v1045_v39 = vsub.f32 %v165_v59, %v941_v44  ;;  %v1050_v36 = vpop.eup %661 }
  0x47   :  { %1758 = vst [vmem:[#allocation47_spill] sm:$0xff] %v1050_v36  ;;  %1759 = vst [vmem:[#allocation48_spill] sm:$0xff] %v1053_v37  ;;  %v1056_v57 = vsub.f32 %v167_v63, %v957_v54  ;;  %v1059_v9 = vsub.f32 %v168_v16, %v963_v58  ;;  %681 = vlog2.f32 %v1037_v30  ;;  %v1062_v43 = vpop.eup %663  ;;  %v1065_v44 = vsub.f32 %v169_v7, %v969_v61 }
  0x48   :  { %1762 = vst [vmem:[#allocation51_spill] sm:$0xff] %v1062_v43  ;;  %v1068_v55 = vsub.f32 %v170_v45, %v973_v62  ;;  %v1071_v49 = vsub.f32 %v171_v40, %v981_v41  ;;  %683 = vlog2.f32 %v1048_v53  ;;  %v1074_v50 = vpop.eup %665  ;;  %v1077_v54 = vsub.f32 %v172_v46, %v985_v29 }
  0x49   :  { %1760 = vst [vmem:[#allocation49_spill] sm:$0xff] %v1056_v57  ;;  %1761 = vst [vmem:[#allocation50_spill] sm:$0xff] %v1059_v9  ;;  %685 = vpow2.f32 %v157_v42  ;;  %v1079_v58 = vsub.f32 %v173_v11, %v189_v15  ;;  %v212_v59 = vmul.f32 -0.5, %v997_v8  ;;  %v1082_v61 = vpop.eup %667  ;;  %v1084_v60 = vsub.f32 %v174_v14, %v190_v51 }
  0x4a   :  { %1763 = vst [vmem:[#allocation52_spill] sm:$0xff] %v1065_v44  ;;  %1764 = vst [vmem:[#allocation53_spill] sm:$0xff] %v1068_v55  ;;  %v221_v62 = vmul.f32 -0.5, %v1006_v27  ;;  %v1088_v41 = vadd.f32 1.0, %v1026_v34  ;;  %v230_v63 = vmul.f32 -0.5, %v1026_v34  ;;  %v1091_v16 = vpop.eup %669  ;;  %687 = vpow2.f32 %v159_v56 }
  0x4b   :  { %1765 = vst [vmem:[#allocation54_spill] sm:$0xff] %v1071_v49  ;;  %1766 = vst [vmem:[#allocation55_spill] sm:$0xff] %v1074_v50  ;;  %v1093_v29 = vsub.f32 %v175_v21, %v191_v20  ;;  %v1095_v15 = vsub.f32 %v176_v48, %v192_v19  ;;  %v1098_v42 = vadd.f32 1.0, %v1039_v31  ;;  %v1100_v7 = vpop.eup %671  ;;  %v215_v45 = vand.u32 2147483647, %v997_v8 }
  0x4c   :  { %1767 = vst [vmem:[#allocation56_spill] sm:$0xff] %v1077_v54  ;;  %1768 = vst [vmem:[#allocation57_spill] sm:$0xff] %v1079_v58  ;;  %v224_v40 = vand.u32 2147483647, %v1006_v27  ;;  %689 = vlog2.f32 %v1088_v41  ;;  %v1106_v46 = vadd.f32 1.0, %v1050_v36  ;;  %v1108_v11 = vpop.eup %673  ;;  %v213_v20 = vadd.f32 1.0, %v212_v59 }
  0x4d   :  { %1769 = vst [vmem:[#allocation58_spill] sm:$0xff] %v1082_v61  ;;  %1770 = vst [vmem:[#allocation59_spill] sm:$0xff] %v1084_v60  ;;  %691 = vlog2.f32 %v1098_v42  ;;  %v239_v19 = vmul.f32 -0.5, %v1039_v31  ;;  %v1113_v56 = vadd.f32 1.0, %v1062_v43  ;;  %v1115_v14 = vpop.eup %675  ;;  %v222_v21 = vadd.f32 1.0, %v221_v62 }
  0x4e   :  { %1771 = vst [vmem:[#allocation60_spill] sm:$0xff] %v1091_v16  ;;  %1772 = vst [vmem:[#allocation61_spill] sm:$0xff] %v1093_v29  ;;  %v231_v48 = vadd.f32 1.0, %v230_v63  ;;  %693 = vlog2.f32 %v1106_v46  ;;  %v1119_v51 = vadd.f32 1.0, %v1074_v50  ;;  %v233_v59 = vand.u32 2147483647, %v1026_v34 }
  0x4f   :  { %1773 = vst [vmem:[#allocation62_spill] sm:$0xff] %v1095_v15  ;;  %1774 = vst [vmem:[#allocation63_spill] sm:$0xff] %v1100_v7  ;;  %v1121_v15 = vpop.eup %677  ;;  %v248_v29 = vmul.f32 -0.5, %v1050_v36  ;;  %695 = vlog2.f32 %v1113_v56  ;;  %v257_v47 = vmul.f32 -0.5, %v1062_v43  ;;  %vm1129_vm0 = vcmp.lt.f32.partialorder %v215_v45, 0.0004427343 }
  0x50   :  { %1775 = vst [vmem:[#allocation64_spill] sm:$0xff] %v1108_v11  ;;  %v1127_v28 = vpop.eup %679  ;;  %v242_v63 = vand.u32 2147483647, %v1039_v31  ;;  %697 = vlog2.f32 %v1119_v51  ;;  %v266_v10 = vmul.f32 -0.5, %v1074_v50  ;;  %vm1136_vm1 = vcmp.lt.f32.partialorder %v224_v40, 0.0004427343 }
  0x51   :  { %v682_v23 = vpop.eup %681  ;;  %v240_v33 = vadd.f32 1.0, %v239_v19  ;;  %v251_v32 = vand.u32 2147483647, %v1050_v36  ;;  %v275_v26 = vmul.f32 -0.5, %v1082_v61  ;;  %v1143_v25 = vmul.f32 %v997_v8, %v213_v20  ;;  %v1825_v62 = vld [vmem:[#allocation48_spill] sm:$0xff] }
  0x52   :  { %v684_v45 = vpop.eup %683  ;;  %v1146_v24 = vmul.f32 %v1006_v27, %v222_v21  ;;  %v1149_v17 = vmul.f32 %v1026_v34, %v231_v48  ;;  %v1152_v40 = vadd.f32 1.0, %v1082_v61  ;;  %vm1156_vm2 = vcmp.lt.f32.partialorder %v233_v59, 0.0004427343  ;;  %v1828_v21 = vld [vmem:[#allocation49_spill] sm:$0xff] }
  0x53   :  { %v1154_v13 = vpop.eup %685  ;;  %v249_v12 = vadd.f32 1.0, %v248_v29  ;;  %v258_v6 = vadd.f32 1.0, %v257_v47  ;;  %v260_v20 = vand.u32 2147483647, %v1062_v43  ;;  %v269_v8 = vand.u32 2147483647, %v1074_v50 }
  0x54   :  { %vm1162_vm3 = vcmp.lt.f32.partialorder %v242_v63, 0.0004427343  ;;  %v267_v48 = vadd.f32 1.0, %v266_v10  ;;  %699 = vlog2.f32 %v1152_v40  ;;  %v1168_v34 = vadd.f32 1.0, %v1091_v16  ;;  %v1170_v59 = vpop.eup %687 }
  0x55   :  { %v1172_v27 = vmul.f32 0.6931472, %v682_v23  ;;  %v1174_v29 = vmul.f32 0.6931472, %v684_v45  ;;  %v1177_v47 = vmul.f32 %v1039_v31, %v240_v33  ;;  %vm1179_vm4 = vcmp.lt.f32.partialorder %v251_v32, 0.0004427343 }
  0x56   :  { %1784 = vst [vmem:[#allocation65_spill] sm:$0xff] %v1168_v34  ;;  %v276_v5 = vadd.f32 1.0, %v275_v26  ;;  %v690_v10 = vpop.eup %689  ;;  %v278_v60 = vand.u32 2147483647, %v1082_v61  ;;  %701 = vlog2.f32 %v1168_v34  ;;  %v284_v4 = vmul.f32 -0.5, %v1091_v16 }
  0x57   :  { %v1187_v23 = vadd.f32 1.0, %v1100_v7  ;;  %v692_v45 = vpop.eup %691  ;;  %v1190_v3 = vmul.f32 %v1050_v36, %v249_v12  ;;  %v1193_v32 = vmul.f32 %v1062_v43, %v258_v6  ;;  %vm1195_vm5 = vcmp.lt.f32.partialorder %v260_v20, 0.0004427343 }
  0x58   :  { %vm1199_vm6 = vcmp.lt.f32.partialorder %v269_v8, 0.0004427343  ;;  %v694_v31 = vpop.eup %693  ;;  %v1204_v2 = vmul.f32 %v1074_v50, %v267_v48  ;;  %v293_v12 = vmul.f32 -0.5, %v1100_v7  ;;  %v1209_v36 = vadd.f32 1.0, %v1108_v11 }
  0x59   :  { %1787 = vst [vmem:[#allocation66_spill] sm:$0xff] %v1187_v23  ;;  %703 = vlog2.f32 %v1187_v23  ;;  %v696_v6 = vpop.eup %695  ;;  %v1219_v48 = vmul.f32 0.6931472, %v690_v10  ;;  %v1222_v50 = vmul.f32 %v1082_v61, %v276_v5  ;;  %vm1224_vm7 = vcmp.lt.f32.partialorder %v278_v60, 0.0004427343 }
  0x5a   :  { %1792 = vst [vmem:[#allocation67_spill] sm:$0xff] %v1209_v36  ;;  %v698_v43 = vpop.eup %697  ;;  %v285_v0 = vadd.f32 1.0, %v284_v4  ;;  %v287_v58 = vand.u32 2147483647, %v1091_v16  ;;  %705 = vlog2.f32 %v1209_v36  ;;  %v1231_v8 = vadd.f32 1.0, %v1115_v14 }
  0x5b   :  { %v1233_v54 = vmul.f32 0.6931472, %v692_v45  ;;  %v296_v10 = vand.u32 2147483647, %v1100_v7  ;;  %v302_v5 = vmul.f32 -0.5, %v1108_v11  ;;  %v1238_v20 = vadd.f32 1.0, %v1121_v15 }
  0x5c   :  { %1795 = vst [vmem:[#allocation68_spill] sm:$0xff] %v1231_v8  ;;  %v1240_v60 = vmul.f32 0.6931472, %v694_v31  ;;  %v294_v61 = vadd.f32 1.0, %v293_v12  ;;  %v305_v4 = vand.u32 2147483647, %v1108_v11  ;;  %707 = vlog2.f32 %v1231_v8 }
  0x5d   :  { %1796 = vst [vmem:[#allocation69_spill] sm:$0xff] %v1238_v20  ;;  %v1244_v36 = vmul.f32 0.6931472, %v696_v6  ;;  %v1246_v49 = vmul.f32 0.6931472, %v698_v43  ;;  %709 = vlog2.f32 %v1238_v20  ;;  %v1250_v45 = vadd.f32 1.0, %v1127_v28 }
  0x5e   :  { %1797 = vst [vmem:[#allocation70_spill] sm:$0xff] %v1240_v60  ;;  %v700_v55 = vpop.eup %699  ;;  %v1257_v12 = vmul.f32 %v1091_v16, %v285_v0  ;;  %vm1259_vm8 = vcmp.lt.f32.partialorder %v287_v58, 0.0004427343  ;;  %v311_v43 = vmul.f32 -0.5, %v1115_v14  ;;  %vm1268_vm9 = vcmp.lt.f32.partialorder %v296_v10, 0.0004427343 }
  0x5f   :  { %1798 = vst [vmem:[#allocation71_spill] sm:$0xff] %v1250_v45  ;;  %v303_v23 = vadd.f32 1.0, %v302_v5  ;;  %711 = vlog2.f32 %v1250_v45  ;;  %v1278_v31 = vmul.f32 %v1100_v7, %v294_v61  ;;  %v314_v16 = vand.u32 2147483647, %v1115_v14  ;;  %v1832_v20 = vld [vmem:[#allocation52_spill] sm:$0xff]  ;;  %v1837_v58 = vld [vmem:[#allocation54_spill] sm:$0xff] }
  0x60   :  { %v702_v0 = vpop.eup %701  ;;  %v320_v6 = vmul.f32 -0.5, %v1121_v15  ;;  %v262_v10 = vsel %vm1195_vm5, %v1193_v32, %v1244_v36  ;;  %v271_v5 = vsel %vm1199_vm6, %v1204_v2, %v1246_v49  ;;  %v1290_v45 = vmul.f32 0.6931472, %v700_v55  ;;  %v1834_v63 = vld [vmem:[#allocation66_spill] sm:$0xff] }
  0x61   :  { %vm1292_vm10 = vcmp.lt.f32.partialorder %v305_v4, 0.0004427343  ;;  %v312_v7 = vadd.f32 1.0, %v311_v43  ;;  %v329_v44 = vmul.f32 -0.5, %v1127_v28  ;;  %v1298_v9 = vadd.f32 1.0, %v1154_v13 }
  0x62   :  { %v338_v36 = vmul.f32 -0.5, %v1154_v13  ;;  %v283_v32 = vmul.f32 0.6931472, %v702_v0  ;;  %v304_v33 = vmul.f32 %v1108_v11, %v303_v23  ;;  %v323_v2 = vand.u32 2147483647, %v1121_v15 }
  0x63   :  { %v704_v61 = vpop.eup %703  ;;  %1805 = vst [vmem:[#allocation72_spill] sm:$0xff] %v1298_v9  ;;  %v1304_v55 = vadd.f32 1.0, %v1170_v59  ;;  %vm1306_vm11 = vcmp.lt.f32.partialorder %v314_v16, 0.0004427343  ;;  %v321_v4 = vadd.f32 1.0, %v320_v6  ;;  %713 = vlog2.f32 %v1298_v9 }
  0x64   :  { %v706_v49 = vpop.eup %705  ;;  %v332_v43 = vand.u32 2147483647, %v1127_v28  ;;  %v280_v23 = vsel %vm1224_vm7, %v1222_v50, %v1290_v45  ;;  %v292_v0 = vmul.f32 0.6931472, %v704_v61  ;;  %v347_v11 = vmul.f32 -0.5, %v1170_v59 }
  0x65   :  { %715 = vlog2.f32 %v1304_v55  ;;  %v313_v16 = vmul.f32 %v1115_v14, %v312_v7  ;;  %v330_v34 = vadd.f32 1.0, %v329_v44  ;;  %v339_v37 = vadd.f32 1.0, %v338_v36 }
  0x66   :  { %v708_v57 = vpop.eup %707  ;;  %717 = vrcp.f32 %v1037_v30  ;;  %v289_v9 = vsel %vm1259_vm8, %v1257_v12, %v283_v32  ;;  %v301_v60 = vmul.f32 0.6931472, %v706_v49  ;;  %vm1323_vm12 = vcmp.lt.f32.partialorder %v323_v2, 0.0004427343  ;;  %v1841_v49 = vld [vmem:[#allocation57_spill] sm:$0xff] }
  0x67   :  { %v710_v6 = vpop.eup %709  ;;  %719 = vrcp.f32 %v1048_v53  ;;  %v322_v50 = vmul.f32 %v1121_v15, %v321_v4  ;;  %vm1329_vm13 = vcmp.lt.f32.partialorder %v332_v43, 0.0004427343  ;;  %v298_v8 = vsel %vm1268_vm9, %v1278_v31, %v292_v0  ;;  %v1844_v4 = vld [vmem:[#allocation11_spill] sm:$0xff]  ;;  %v1845_v43 = vld [vmem:[#allocation12_spill] sm:$0xff]  ;;  %v1873_v30 = vld [vmem:[#allocation33_spill] sm:$0xff] }
  0x68   :  { %721 = vrcp.f32 %v1088_v41  ;;  %v310_v45 = vmul.f32 0.6931472, %v708_v57  ;;  %v348_v12 = vadd.f32 1.0, %v347_v11  ;;  %v319_v53 = vmul.f32 0.6931472, %v710_v6  ;;  %v1846_v0 = vld [vmem:[#allocation68_spill] sm:$0xff] }
  0x69   :  { %v712_v44 = vpop.eup %711  ;;  %723 = vrcp.f32 %v1098_v42  ;;  %v331_v61 = vmul.f32 %v1127_v28, %v330_v34  ;;  %v1341_v36 = vmul.f32 %v1154_v13, %v339_v37  ;;  %v307_v41 = vsel %vm1292_vm10, %v304_v33, %v301_v60  ;;  %v1835_v60 = vld [vmem:[#allocation53_spill] sm:$0xff]  ;;  %v1848_v6 = vld [vmem:[#allocation14_spill] sm:$0xff] }
  0x6a   :  { %725 = vrcp.f32 %v1106_v46  ;;  %v1813_v57 = vsel %vm1129_vm0, %v1143_v25, %v1172_v27  ;;  %v328_v34 = vmul.f32 0.6931472, %v712_v44  ;;  %v1815_v37 = vsel %vm1136_vm1, %v1146_v24, %v1174_v29  ;;  %v1830_v29 = vld [vmem:[#allocation50_spill] sm:$0xff]  ;;  %v1851_v44 = vld [vmem:[#allocation59_spill] sm:$0xff] }
  0x6b   :  { %1812 = vst [vmem:[#allocation73_spill] sm:$0xff] %v1341_v36  ;;  %v1353_v42 = vadd.f32 %v1813_v57, %v1024_v38  ;;  %727 = vrcp.f32 %v1113_v56  ;;  %v1362_v46 = vadd.f32 %v1815_v37, %v1031_v22  ;;  %v1817_v11 = vsel %vm1156_vm2, %v1149_v17, %v1219_v48  ;;  %v1856_v57 = vld [vmem:[#allocation69_spill] sm:$0xff]  ;;  %v1858_v37 = vld [vmem:[#allocation18_spill] sm:$0xff] }
  0x6c   :  { %v1370_v25 = vadd.f32 %v1817_v11, %v1034_v52  ;;  %729 = vrcp.f32 %v1119_v51  ;;  %v316_v38 = vsel %vm1306_vm11, %v313_v16, %v310_v45  ;;  %v1376_v18 = vmul.f32 %v1170_v59, %v348_v12  ;;  %v1822_v52 = vld [vmem:[#allocation70_spill] sm:$0xff]  ;;  %v1847_v16 = vld [vmem:[#allocation13_spill] sm:$0xff]  ;;  %v1853_v45 = vld [vmem:[#allocation16_spill] sm:$0xff] }
  0x6d   :  { %1814 = vst [vmem:[#allocation74_spill] sm:$0xff] %v1353_v42  ;;  %1816 = vst [vmem:[#allocation75_spill] sm:$0xff] %v1362_v46  ;;  %v1820_v22 = vsel %vm1162_vm3, %v1177_v47, %v1233_v54  ;;  %731 = vrcp.f32 %v1152_v40  ;;  %v714_v17 = vpop.eup %713  ;;  %v325_v27 = vsel %vm1323_vm12, %v322_v50, %v319_v53  ;;  %v1823_v56 = vsel %vm1179_vm4, %v1190_v3, %v1822_v52  ;;  %v1827_v54 = vld [vmem:[#allocation65_spill] sm:$0xff]  ;;  %v1854_v12 = vld [vmem:[#allocation39_spill] sm:$0xff] }
  0x6e   :  { %1818 = vst [vmem:[#allocation76_spill] sm:$0xff] %v1370_v25  ;;  %1819 = vst [vmem:[#allocation77_spill] sm:$0xff] %v1376_v18  ;;  %v1384_v24 = vadd.f32 %v1820_v22, %v1042_v35  ;;  %v1395_v51 = vadd.f32 %v1823_v56, %v1045_v39  ;;  %v1398_v19 = vadd.f32 %v262_v10, %v1825_v62  ;;  %733 = vrcp.f32 %v1827_v54  ;;  %v1859_v11 = vld [vmem:[#allocation19_spill] sm:$0xff]  ;;  %v1862_v52 = vld [vmem:[#allocation45_spill] sm:$0xff] }
  0x6f   :  { %v716_v35 = vpop.eup %715  ;;  %v1402_v40 = vadd.f32 %v271_v5, %v1828_v21  ;;  %v1405_v47 = vadd.f32 %v280_v23, %v1830_v29  ;;  %v1408_v48 = vadd.f32 %v289_v9, %v1832_v20  ;;  %735 = vrcp.f32 %v1834_v63  ;;  %v1839_v5 = vld [vmem:[#allocation56_spill] sm:$0xff]  ;;  %v1843_v9 = vld [vmem:[#allocation67_spill] sm:$0xff]  ;;  %v1863_v62 = vld [vmem:[#allocation25_spill] sm:$0xff] }
  0x70   :  { %1821 = vst [vmem:[#allocation78_spill] sm:$0xff] %v1384_v24  ;;  %1824 = vst [vmem:[#allocation70_spill] sm:$0xff] %v1395_v51  ;;  %v718_v3 = vpop.eup %717  ;;  %v334_v39 = vsel %vm1329_vm13, %v331_v61, %v328_v34  ;;  %v1414_v31 = vadd.f32 %v298_v8, %v1835_v60  ;;  %v1417_v10 = vadd.f32 %v307_v41, %v1837_v58  ;;  %737 = vrcp.f32 %v1843_v9  ;;  %v1857_v34 = vld [vmem:[#allocation17_spill] sm:$0xff]  ;;  %v1864_v21 = vld [vmem:[#allocation26_spill] sm:$0xff] }
  0x71   :  { %1826 = vst [vmem:[#allocation48_spill] sm:$0xff] %v1398_v19  ;;  %1829 = vst [vmem:[#allocation65_spill] sm:$0xff] %v1402_v40  ;;  %v1420_v33 = vadd.f32 %v316_v38, %v1839_v5  ;;  %v720_v2 = vpop.eup %719  ;;  %v1423_v26 = vadd.f32 %v325_v27, %v1841_v49  ;;  %vm417_vm14 = vcmp.ge.f32.partialorder %v1844_v4, 0.0  ;;  %vm418_vm15 = vcmp.ge.f32.partialorder %v1845_v43, 0.0  ;;  %v1860_v38 = vld [vmem:[#allocation42_spill] sm:$0xff]  ;;  %v1861_v27 = vld [vmem:[#allocation20_spill] sm:$0xff] }
  0x72   :  { %1831 = vst [vmem:[#allocation49_spill] sm:$0xff] %v1405_v47  ;;  %1833 = vst [vmem:[#allocation50_spill] sm:$0xff] %v1408_v48  ;;  %v722_v23 = vpop.eup %721  ;;  %739 = vrcp.f32 %v1846_v0  ;;  %vm419_vm0 = vcmp.ge.f32.partialorder %v1847_v16, 0.0  ;;  %vm420_vm1 = vcmp.ge.f32.partialorder %v1848_v6, 0.0  ;;  %vm421_vm2 = vcmp.ge.f32.partialorder %v1849_v1, 0.0  ;;  %v1865_v29 = vld [vmem:[#allocation27_spill] sm:$0xff] }
  0x73   :  { %1836 = vst [vmem:[#allocation52_spill] sm:$0xff] %v1414_v31  ;;  %1838 = vst [vmem:[#allocation66_spill] sm:$0xff] %v1417_v10  ;;  %v724_v50 = vpop.eup %723  ;;  %v1432_v7 = vmul.f32 0.6931472, %v714_v17  ;;  %v1435_v8 = vadd.f32 %v334_v39, %v1851_v44  ;;  %vm422_vm3 = vcmp.ge.f32.partialorder %v1853_v45, 0.0  ;;  %v433_v53 = vmul.f32 %v718_v3, %v1854_v12  ;;  %v1866_v39 = vld [vmem:[#allocation71_spill] sm:$0xff] }
  0x74   :  { %1840 = vst [vmem:[#allocation53_spill] sm:$0xff] %v1420_v33  ;;  %1842 = vst [vmem:[#allocation54_spill] sm:$0xff] %v1423_v26  ;;  %v726_v61 = vpop.eup %725  ;;  %v1439_v41 = vmul.f32 0.6931472, %v716_v35  ;;  %741 = vrcp.f32 %v1856_v57  ;;  %vm423_vm4 = vcmp.ge.f32.partialorder %v1857_v34, 0.0  ;;  %vm424_vm5 = vcmp.ge.f32.partialorder %v1858_v37, 0.0 }
  0x75   :  { %1850 = vst [vmem:[#allocation56_spill] sm:$0xff] %v1432_v7  ;;  %1852 = vst [vmem:[#allocation57_spill] sm:$0xff] %v1435_v8  ;;  %vm425_vm6 = vcmp.ge.f32.partialorder %v1859_v11, 0.0  ;;  %v434_v22 = vmul.f32 %v720_v2, %v1860_v38  ;;  %v728_v17 = vpop.eup %727  ;;  %vm426_vm7 = vcmp.ge.f32.partialorder %v1861_v27, 0.0  ;;  %v435_v56 = vmul.f32 %v722_v23, %v1862_v52  ;;  %v1867_v60 = vld [vmem:[#allocation46_spill] sm:$0xff]  ;;  %v1869_v9 = vld [vmem:[#allocation31_spill] sm:$0xff] }
  0x76   :  { %1855 = vst [vmem:[#allocation67_spill] sm:$0xff] %v1439_v41  ;;  %v465_v54 = vmul.f32 2.0, %v1863_v62  ;;  %v466_v35 = vmul.f32 2.0, %v1864_v21  ;;  %v467_v20 = vmul.f32 2.0, %v1865_v29  ;;  %v730_v63 = vpop.eup %729  ;;  %743 = vrcp.f32 %v1866_v39  ;;  %v1868_v5 = vld [vmem:[#allocation30_spill] sm:$0xff]  ;;  %v1870_v12 = vld [vmem:[#allocation72_spill] sm:$0xff] }
  0x77   :  { %v436_v58 = vmul.f32 %v724_v50, %v1867_v60  ;;  %v468_v49 = vmul.f32 2.0, %v1868_v5  ;;  %v1455_v0 = vmul.f32 2.0, %v1869_v9  ;;  %v732_v44 = vpop.eup %731  ;;  %745 = vrcp.f32 %v1870_v12  ;;  %v1871_v57 = vld [vmem:[#allocation21_spill] sm:$0xff]  ;;  %v1872_v52 = vld [vmem:[#allocation32_spill] sm:$0xff]  ;;  %v1874_v8 = vld [vmem:[#allocation22_spill] sm:$0xff] }
  0x78   :  { %vm427_vm8 = vcmp.ge.f32.partialorder %v1871_v57, 0.0  ;;  %v449_v38 = vsel %vm417_vm14, %v718_v3, %v433_v53  ;;  %v1462_v32 = vmul.f32 2.0, %v1872_v52  ;;  %v1465_v39 = vmul.f32 2.0, %v1873_v30  ;;  %v734_v60 = vpop.eup %733  ;;  %v1875_v26 = vld [vmem:[#allocation47_spill] sm:$0xff]  ;;  %v1876_v12 = vld [vmem:[#allocation34_spill] sm:$0xff]  ;;  %v1884_v16 = vld [vmem:[#allocation60_spill] sm:$0xff] }
  0x79   :  { %vm428_vm9 = vcmp.ge.f32.partialorder %v1874_v8, 0.0  ;;  %v437_v33 = vmul.f32 %v726_v61, %v1875_v26  ;;  %v450_v18 = vsel %vm418_vm15, %v720_v2, %v434_v22  ;;  %v1472_v41 = vmul.f32 2.0, %v1876_v12  ;;  %v1877_v10 = vld [vmem:[#allocation35_spill] sm:$0xff]  ;;  %v736_v3 = vpop.eup %735  ;;  %v1880_v26 = vld [vmem:[#allocation36_spill] sm:$0xff]  ;;  %v1881_v22 = vld [vmem:[#allocation37_spill] sm:$0xff] }
  0x7a   :  { %v1475_v4 = vmul.f32 2.0, %v1877_v10  ;;  %747 = vrcp.f32 %v1304_v55  ;;  %v1878_v53 = vld [vmem:[#allocation51_spill] sm:$0xff]  ;;  %v451_v7 = vsel %vm419_vm0, %v722_v23, %v435_v56  ;;  %v481_v31 = vsub.f32 1.0, %v465_v54  ;;  %v738_v19 = vpop.eup %737  ;;  %v1885_v56 = vld [vmem:[#allocation38_spill] sm:$0xff]  ;;  %v1886_v6 = vld [vmem:[#allocation24_spill] sm:$0xff] }
  0x7b   :  { %v438_v36 = vmul.f32 %v728_v17, %v1878_v53  ;;  %v1879_v48 = vld [vmem:[#allocation23_spill] sm:$0xff]  ;;  %v452_v2 = vsel %vm420_vm1, %v724_v50, %v436_v58  ;;  %v1485_v43 = vmul.f32 2.0, %v1880_v26  ;;  %v1488_v47 = vmul.f32 2.0, %v1881_v22  ;;  %v1883_v53 = vld [vmem:[#allocation58_spill] sm:$0xff]  ;;  %v1888_v26 = vld [vmem:[#allocation40_spill] sm:$0xff] }
  0x7c   :  { %vm429_vm10 = vcmp.ge.f32.partialorder %v1879_v48, 0.0  ;;  %v482_v40 = vsub.f32 1.0, %v466_v35  ;;  %v1882_v55 = vld [vmem:[#allocation55_spill] sm:$0xff]  ;;  %v440_v10 = vmul.f32 %v732_v44, %v1883_v53  ;;  %v441_v23 = vmul.f32 %v734_v60, %v1884_v16  ;;  %v740_v24 = vpop.eup %739  ;;  %v1889_v53 = vld [vmem:[#allocation41_spill] sm:$0xff]  ;;  %v1890_v46 = vld [vmem:[#allocation64_spill] sm:$0xff] }
  0x7d   :  { %v439_v51 = vmul.f32 %v730_v63, %v1882_v55  ;;  %v1494_v54 = vmul.f32 2.0, %v1885_v56  ;;  %vm430_vm11 = vcmp.ge.f32.partialorder %v1886_v6, 0.0  ;;  %v1887_v50 = vld [vmem:[#allocation63_spill] sm:$0xff]  ;;  %v453_v22 = vsel %vm421_vm2, %v726_v61, %v437_v33  ;;  %v1892_v1 = vld [vmem:[#allocation44_spill] sm:$0xff] }
  0x7e   :  { %v442_v58 = vmul.f32 %v736_v3, %v1887_v50  ;;  %v1501_v35 = vmul.f32 2.0, %v1888_v26  ;;  %v483_v12 = vsub.f32 1.0, %v467_v20  ;;  %v454_v55 = vsel %vm422_vm3, %v728_v17, %v438_v36  ;;  %v742_v30 = vpop.eup %741  ;;  %v1891_v52 = vld [vmem:[#allocation43_spill] sm:$0xff] }
  0x7f   :  { %v1506_v16 = vmul.f32 2.0, %v1889_v53  ;;  %v484_v56 = vsub.f32 1.0, %v468_v49  ;;  %v497_v25 = vmul.f32 %v481_v31, %v449_v38  ;;  %v443_v42 = vmul.f32 %v738_v19, %v1890_v46  ;;  %v1893_v46 = vld [vmem:[#allocation28_spill] sm:$0xff] }
  0x80   :  { %v1510_v50 = vmul.f32 2.0, %v1891_v52  ;;  %v1513_v33 = vmul.f32 2.0, %v1892_v1  ;;  %v498_v61 = vmul.f32 %v482_v40, %v450_v18  ;;  %v444_v20 = vmul.f32 %v740_v24, %v1115_v14  ;;  %v744_v17 = vpop.eup %743 }
  0x81   :  { %v455_v36 = vsel %vm423_vm4, %v730_v63, %v439_v51  ;;  %v456_v45 = vsel %vm424_vm5, %v732_v44, %v440_v10  ;;  %v457_v31 = vsel %vm425_vm6, %v734_v60, %v441_v23  ;;  %vm431_vm12 = vcmp.ge.f32.partialorder %v1893_v46, 0.0  ;;  %v746_v40 = vpop.eup %745 }
  0x82   :  { %v458_v49 = vsel %vm426_vm7, %v736_v3, %v442_v58  ;;  %v485_v38 = vsub.f32 1.0, %v1455_v0  ;;  %v486_v18 = vsub.f32 1.0, %v1462_v32  ;;  %v499_v14 = vmul.f32 %v483_v12, %v451_v7 }
  0x83   :  { %v445_v51 = vmul.f32 %v742_v30, %v1121_v15  ;;  %v487_v34 = vsub.f32 1.0, %v1465_v39  ;;  %v500_v10 = vmul.f32 %v484_v56, %v452_v2  ;;  %v513_v37 = vadd.f32 %v497_v25, %v1863_v62  ;;  %v1894_v25 = vld [vmem:[#allocation29_spill] sm:$0xff] }
  0x84   :  { %v459_v11 = vsel %vm427_vm8, %v738_v19, %v443_v42  ;;  %v488_v63 = vsub.f32 1.0, %v1472_v41  ;;  %v489_v27 = vsub.f32 1.0, %v1475_v4  ;;  %v514_v0 = vadd.f32 %v498_v61, %v1864_v21  ;;  %v748_v44 = vpop.eup %747 }
  0x85   :  { %v446_v32 = vmul.f32 %v744_v17, %v1127_v28  ;;  %v460_v15 = vsel %vm428_vm9, %v740_v24, %v444_v20  ;;  %v490_v7 = vsub.f32 1.0, %v1485_v43  ;;  %v491_v39 = vsub.f32 1.0, %v1488_v47  ;;  %v1897_v20 = vld [vmem:[#allocation75_spill] sm:$0xff] }
  0x86   :  { %vm432_vm13 = vcmp.ge.f32.partialorder %v1894_v25, 0.0  ;;  %v447_v42 = vmul.f32 %v746_v40, %v1154_v13  ;;  %v492_v19 = vsub.f32 1.0, %v1494_v54  ;;  %v501_v41 = vmul.f32 %v485_v38, %v453_v22 }
  0x87   :  { %v515_v57 = vadd.f32 %v499_v14, %v1865_v29  ;;  %v461_v60 = vsel %vm429_vm10, %v742_v30, %v445_v51  ;;  %v502_v28 = vmul.f32 %v486_v18, %v454_v55  ;;  %v516_v8 = vadd.f32 %v500_v10, %v1868_v5  ;;  %v1898_v14 = vld [vmem:[#allocation33_spill] sm:$0xff]  ;;  %v1899_v51 = vld [vmem:[#allocation76_spill] sm:$0xff] }
  0x88   :  { %v529_v24 = vmul.f32 %v513_v37, %v513_v37  ;;  %v493_v12 = vsub.f32 1.0, %v1501_v35  ;;  %v530_v4 = vmul.f32 %v514_v0, %v514_v0  ;;  %v561_v47 = vmul.f32 -0.5, %v1863_v62  ;;  %v1895_v35 = vld [vmem:[#allocation32_spill] sm:$0xff]  ;;  %v1900_v0 = vld [vmem:[#allocation34_spill] sm:$0xff] }
  0x89   :  { %v562_v3 = vmul.f32 -0.5, %v1864_v21  ;;  %v448_v2 = vmul.f32 %v748_v44, %v1170_v59  ;;  %v462_v43 = vsel %vm430_vm11, %v744_v17, %v446_v32  ;;  %v494_v22 = vsub.f32 1.0, %v1506_v16  ;;  %v1896_v21 = vld [vmem:[#allocation74_spill] sm:$0xff] }
  0x8a   :  { %v503_v48 = vmul.f32 %v487_v34, %v455_v36  ;;  %v495_v30 = vsub.f32 1.0, %v1510_v50  ;;  %v517_v23 = vadd.f32 %v501_v41, %v1869_v9  ;;  %v531_v56 = vmul.f32 %v515_v57, %v515_v57  ;;  %v1901_v41 = vld [vmem:[#allocation78_spill] sm:$0xff] }
  0x8b   :  { %v563_v54 = vmul.f32 -0.5, %v1865_v29  ;;  %v504_v58 = vmul.f32 %v488_v63, %v456_v45  ;;  %v518_v62 = vadd.f32 %v502_v28, %v1895_v35  ;;  %v532_v55 = vmul.f32 %v516_v8, %v516_v8  ;;  %v1902_v28 = vld [vmem:[#allocation35_spill] sm:$0xff] }
  0x8c   :  { %v545_v61 = vmul.f32 %v529_v24, %v1896_v21  ;;  %v546_v38 = vmul.f32 %v530_v4, %v1897_v20  ;;  %v564_v6 = vmul.f32 -0.5, %v1868_v5  ;;  %v577_v17 = vadd.f32 0.75, %v561_v47  ;;  %v1912_v21 = vld [vmem:[#allocation37_spill] sm:$0xff] }
  0x8d   :  { %v578_v16 = vadd.f32 0.75, %v562_v3  ;;  %v463_v50 = vsel %vm431_vm12, %v746_v40, %v447_v42  ;;  %v496_v36 = vsub.f32 1.0, %v1513_v33  ;;  %v505_v18 = vmul.f32 %v489_v27, %v457_v31 }
  0x8e   :  { %v519_v29 = vadd.f32 %v503_v48, %v1898_v14  ;;  %v533_v45 = vmul.f32 %v517_v23, %v517_v23  ;;  %v547_v34 = vmul.f32 %v531_v56, %v1899_v51  ;;  %v565_v10 = vmul.f32 -0.5, %v1869_v9  ;;  %v1907_v56 = vld [vmem:[#allocation36_spill] sm:$0xff] }
  0x8f   :  { %v579_v37 = vadd.f32 0.75, %v563_v54  ;;  %v506_v63 = vmul.f32 %v490_v7, %v458_v49  ;;  %v520_v32 = vadd.f32 %v504_v58, %v1900_v0  ;;  %v534_v5 = vmul.f32 %v518_v62, %v518_v62  ;;  %v1906_v7 = vld [vmem:[#allocation70_spill] sm:$0xff]  ;;  %v1923_v49 = vld [vmem:[#allocation53_spill] sm:$0xff] }
  0x90   :  { %v548_v57 = vmul.f32 %v532_v55, %v1901_v41  ;;  %v566_v46 = vmul.f32 -0.5, %v1895_v35  ;;  %v580_v40 = vadd.f32 0.75, %v564_v6  ;;  %v593_v42 = vmul.f32 %v577_v17, %v545_v61 }
  0x91   :  { %v594_v33 = vmul.f32 %v578_v16, %v546_v38  ;;  %v464_v31 = vsel %vm432_vm13, %v748_v44, %v448_v2  ;;  %v507_v27 = vmul.f32 %v491_v39, %v459_v11  ;;  %v521_v8 = vadd.f32 %v505_v18, %v1902_v28  ;;  %v1908_v11 = vld [vmem:[#allocation48_spill] sm:$0xff]  ;;  %v1914_v18 = vld [vmem:[#allocation38_spill] sm:$0xff] }
  0x92   :  { %v535_v24 = vmul.f32 %v519_v29, %v519_v29  ;;  %v1903_v9 = vand.u32 2147483647, %v1154_v13  ;;  %v549_v4 = vmul.f32 %v533_v45, %v1906_v7  ;;  %v567_v47 = vmul.f32 -0.5, %v1898_v14  ;;  %v1915_v45 = vld [vmem:[#allocation49_spill] sm:$0xff] }
  0x93   :  { %v581_v3 = vadd.f32 0.75, %v565_v10  ;;  %v595_v48 = vmul.f32 %v579_v37, %v547_v34  ;;  %v508_v23 = vmul.f32 %v492_v19, %v460_v15  ;;  %v522_v25 = vadd.f32 %v506_v63, %v1907_v56  ;;  %v1913_v19 = vld [vmem:[#allocation65_spill] sm:$0xff] }
  0x94   :  { %vm1575_vm14 = vcmp.lt.f32.partialorder %v1903_v9, 0.0004427343  ;;  %v536_v44 = vmul.f32 %v520_v32, %v520_v32  ;;  %v550_v39 = vmul.f32 %v534_v5, %v1908_v11  ;;  %v1909_v2 = vand.u32 2147483647, %v1170_v59  ;;  %v1916_v32 = vld [vmem:[#allocation50_spill] sm:$0xff]  ;;  %v1919_v9 = vld [vmem:[#allocation73_spill] sm:$0xff] }
  0x95   :  { %v568_v54 = vmul.f32 -0.5, %v1900_v0  ;;  %v582_v58 = vadd.f32 0.75, %v566_v46  ;;  %v596_v35 = vmul.f32 %v580_v40, %v548_v57  ;;  %v610_v62 = vadd.f32 %v594_v33, %v593_v42  ;;  %v1917_v33 = vld [vmem:[#allocation52_spill] sm:$0xff] }
  0x96   :  { %vm1585_vm15 = vcmp.lt.f32.partialorder %v1909_v2, 0.0004427343  ;;  %v509_v55 = vmul.f32 %v493_v12, %v461_v60  ;;  %v523_v61 = vadd.f32 %v507_v27, %v1912_v21  ;;  %v537_v15 = vmul.f32 %v521_v8, %v521_v8 }
  0x97   :  { %v551_v20 = vmul.f32 %v535_v24, %v1913_v19  ;;  %v569_v38 = vmul.f32 -0.5, %v1902_v28  ;;  %v583_v6 = vadd.f32 0.75, %v567_v47  ;;  %v597_v17 = vmul.f32 %v581_v3, %v549_v4  ;;  %v1918_v24 = vld [vmem:[#allocation56_spill] sm:$0xff]  ;;  %v1920_v3 = vld [vmem:[#allocation66_spill] sm:$0xff] }
  0x98   :  { %v611_v59 = vadd.f32 %v610_v62, %v595_v48  ;;  %v510_v16 = vmul.f32 %v494_v22, %v462_v43  ;;  %v524_v14 = vadd.f32 %v508_v23, %v1914_v18  ;;  %v538_v29 = vmul.f32 %v522_v25, %v522_v25  ;;  %v1921_v25 = vld [vmem:[#allocation67_spill] sm:$0xff] }
  0x99   :  { %v552_v51 = vmul.f32 %v536_v44, %v1915_v45  ;;  %v570_v34 = vmul.f32 -0.5, %v1907_v56  ;;  %v584_v10 = vadd.f32 0.75, %v568_v54  ;;  %v598_v60 = vmul.f32 %v582_v58, %v550_v39  ;;  %v1922_v44 = vld [vmem:[#allocation77_spill] sm:$0xff] }
  0x9a   :  { %v612_v12 = vadd.f32 %v611_v59, %v596_v35  ;;  %v511_v37 = vmul.f32 %v495_v30, %v463_v50  ;;  %v525_v63 = vadd.f32 %v509_v55, %v1888_v26  ;;  %v539_v0 = vmul.f32 %v523_v61, %v523_v61 }
  0x9b   :  { %v553_v5 = vmul.f32 %v537_v15, %v1916_v32  ;;  %v571_v41 = vmul.f32 -0.5, %v1912_v21  ;;  %v585_v57 = vadd.f32 0.75, %v569_v38  ;;  %v599_v43 = vmul.f32 %v583_v6, %v551_v20  ;;  %v1924_v21 = vld [vmem:[#allocation61_spill] sm:$0xff]  ;;  %v1925_v15 = vld [vmem:[#allocation54_spill] sm:$0xff] }
  0x9c   :  { %v613_v22 = vadd.f32 %v612_v12, %v597_v17  ;;  %v512_v46 = vmul.f32 %v496_v36, %v464_v31  ;;  %v526_v40 = vadd.f32 %v510_v16, %v1889_v53  ;;  %v540_v42 = vmul.f32 %v524_v14, %v524_v14  ;;  %v1926_v17 = vld [vmem:[#allocation62_spill] sm:$0xff] }
  0x9d   :  { %v554_v27 = vmul.f32 %v538_v29, %v1917_v33  ;;  %v572_v28 = vmul.f32 -0.5, %v1914_v18  ;;  %v586_v8 = vadd.f32 0.75, %v570_v34  ;;  %v600_v30 = vmul.f32 %v584_v10, %v552_v51  ;;  %v1927_v18 = vld [vmem:[#allocation57_spill] sm:$0xff] }
  0x9e   :  { %v614_v50 = vadd.f32 %v613_v22, %v598_v60  ;;  %v343_v7 = vsel %vm1575_vm14, %v1919_v9, %v1918_v24  ;;  %v527_v4 = vadd.f32 %v511_v37, %v1891_v52  ;;  %v541_v47 = vmul.f32 %v525_v63, %v525_v63 }
  0x9f   :  { %v555_v36 = vmul.f32 %v539_v0, %v1920_v3  ;;  %v573_v31 = vmul.f32 -0.5, %v1888_v26  ;;  %v587_v48 = vadd.f32 0.75, %v571_v41  ;;  %v601_v23 = vmul.f32 %v585_v57, %v553_v5 }
  0xa0   :  { %v615_v56 = vadd.f32 %v614_v50, %v599_v43  ;;  %v352_v11 = vsel %vm1585_vm15, %v1922_v44, %v1921_v25  ;;  %v528_v39 = vadd.f32 %v512_v46, %v1892_v1  ;;  %v542_v2 = vmul.f32 %v526_v40, %v526_v40 }
  0xa1   :  { %v556_v54 = vmul.f32 %v540_v42, %v1923_v49  ;;  %v574_v58 = vmul.f32 -0.5, %v1889_v53  ;;  %v588_v35 = vadd.f32 0.75, %v572_v28  ;;  %v602_v62 = vmul.f32 %v586_v8, %v554_v27 }
  0xa2   :  { %v616_v55 = vadd.f32 %v615_v56, %v600_v30  ;;  %v367_v26 = vadd.f32 %v343_v7, %v1924_v21  ;;  %v543_v61 = vmul.f32 %v527_v4, %v527_v4  ;;  %v557_v19 = vmul.f32 %v541_v47, %v1925_v15 }
  0xa3   :  { %v575_v20 = vmul.f32 -0.5, %v1891_v52  ;;  %v589_v38 = vadd.f32 0.75, %v573_v31  ;;  %v603_v13 = vmul.f32 %v587_v48, %v555_v36  ;;  %v368_v59 = vadd.f32 %v352_v11, %v1926_v17 }
  0xa4   :  { %v617_v6 = vadd.f32 %v616_v55, %v601_v23  ;;  %v544_v16 = vmul.f32 %v528_v39, %v528_v39  ;;  %v558_v14 = vmul.f32 %v542_v2, %v1927_v18  ;;  %v576_v53 = vmul.f32 -0.5, %v1892_v1 }
  0xa5   :  { %v590_v29 = vadd.f32 0.75, %v574_v58  ;;  %v604_v45 = vmul.f32 %v588_v35, %v556_v54  ;;  %v559_v34 = vmul.f32 %v543_v61, %v367_v26  ;;  %v591_v10 = vadd.f32 0.75, %v575_v20 }
  0xa6   :  { %v618_v51 = vadd.f32 %v617_v6, %v602_v62  ;;  %v605_v60 = vmul.f32 %v589_v38, %v557_v19  ;;  %v560_v37 = vmul.f32 %v544_v16, %v368_v59  ;;  %v592_v63 = vadd.f32 0.75, %v576_v53 }
  0xa7   :  { %v606_v52 = vmul.f32 %v590_v29, %v558_v14  ;;  %v607_v32 = vmul.f32 %v591_v10, %v559_v34 }
  0xa8   :  { %v619_v12 = vadd.f32 %v618_v51, %v603_v13  ;;  %v608_v41 = vmul.f32 %v592_v63, %v560_v37 }
  0xaa   :  { %v620_v0 = vadd.f32 %v619_v12, %v604_v45 }
  0xac   :  { %v621_v5 = vadd.f32 %v620_v0, %v605_v60 }
  0xae   :  { %v622_v57 = vadd.f32 %v621_v5, %v606_v52 }
  0xb0   :  { %v623_v43 = vadd.f32 %v622_v57, %v607_v32 }
  0xb2   :  { %v624_v22 = vadd.f32 %v623_v43, %v608_v41 }
  0xb4   :  { %626 = vst [vmem:[#allocation7] sm:$0xff] %v624_v22 }
  0xb5   :  { %804 = shalt.err (!%p801_p6)
}
  0xb6   :  { %s805_s10 = scalar_lea.hbm %s1636_s2, 128 }
  0xb7   :  { %p806_p7 = scmp.ne.s32.totalorder %s1636_s2, %s805_s10  ;;  %p809_p8 = scmp.lt.u32.totalorder %s805_s10, %s1636_s2 }
  0xb9   :  { %p811_p9 = pnand %p809_p8, %p806_p7 }
  0xbb   :  { %814 = shalt.err (!%p811_p9)
}
  0xbc   :  { %636 = dma.vmem_to_hbm [thread:$0]  %s634_s6, 128, %s1636_s2, [#allocation4]  }
  0xbd   :  { %819 = dma.done.wait [#allocation4], 128  }
  0xbe   :  { %820 = vsyncadd [#allocation4], 4294967168 }
  0xbf   :  { %640 = vsyncpa [#allocation3], 1 }
  0xc0   :  { %641 = vsyncpa [#allocation6], 1 }
  0xc1   :  { %642 = vsyncpa [#allocation4], 1 }

</bundles_post_ra>
